<compile_context>
chip_gen: v6e
topology: v6e:2x2x1
jax: 0.10.0
libtpu: 0.0.40
codegen_flags: <defaults>
</compile_context>

<pallas_src>
import jax
import jax.numpy as jnp
from jax.experimental import pallas as pl
from jax.experimental.pallas import tpu as pltpu


# ----------------------------------------------------------------------------- kernels
def _attention_fused_kernel(enc_ref, we_ref, o_ref):
    # enc_ref: (bt, L, H)  encoder outputs for this batch block
    # we_ref:  (1, H)      encoder half of the Linear weight row
    # o_ref:   (bt, L)     softmax attention weights (lane-dense store)
    enc = enc_ref[...].astype(jnp.float32)
    w_e = we_ref[...].astype(jnp.float32)

    # Transpose-free matvec: VPU multiply + lane reduce over H (no XLU transpose).
    scores = jnp.sum(enc * w_e[None, :, :], axis=-1)          # (bt, L), f32

    # Softmax over src_len (last / lane axis).
    m = jnp.max(scores, axis=-1, keepdims=True)
    p = jnp.exp(scores - m)
    denom = jnp.sum(p, axis=-1, keepdims=True)
    # EUP approximate reciprocal + one Newton-Raphson step -> full f32 accuracy.
    r = pl.reciprocal(denom, approx=True)
    r = r * (2.0 - denom * r)

    o_ref[...] = (p * r).astype(o_ref.dtype)                  # unmasked (bt, L) store


def _scores_kernel(enc_ref, we_ref, o_ref):
    # Fallback (large L*H): raw scores only; softmax is done by XLA afterwards.
    # enc_ref: (1, lt, H); we_ref: (1, H); o_ref: (1, 1, lt)
    enc = enc_ref[...].astype(jnp.float32)
    w_e = we_ref[...].astype(jnp.float32)
    scores = jnp.sum(enc * w_e[None, :, :], axis=-1)          # (1, lt)
    o_ref[...] = scores[:, None, :]                           # leading expand: free


# ----------------------------------------------------------------------------- budgets / tiling
def _vmem_capacity_bytes():
    """Best-effort VMEM capacity query; conservative (v7x per-TC) fallback."""
    try:
        info = pltpu.get_tpu_info()
        cap = getattr(info, "vmem_capacity_bytes", None)
        if cap:
            return int(cap)
    except Exception:
        pass
    return 64 << 20


def _vmem_limit_bytes(tile_bytes, vmem_cap):
    """2x (double-buffered) tiles + slack, clamped to a generation-safe cap."""
    want = 2 * tile_bytes + (8 << 20)
    return int(min(max(want, 16 << 20), 48 << 20, (vmem_cap * 7) // 10))


def _pick_batch_tile(batch, row_bytes, tile_budget_bytes):
    """Pick the batch tile bt for the fused path, or None to use the L-tiled fallback.

    bt must divide B and be (a multiple of 8 or equal to B) so the 2-D (bt, L)
    output block is legal under the (8, 128) block-shape rule.  Among fitting
    tiles, prefer an even grid-step count (balanced split across v7x's two
    TensorCores), then any multi-step count, then the largest tile.
    """
    valid = [d for d in range(8, batch, 8) if batch % d == 0] + [batch]
    fitting = [d for d in valid if d * row_bytes <= tile_budget_bytes]
    if not fitting:
        return None
    even = [d for d in fitting if (batch // d) % 2 == 0]
    multi = [d for d in fitting if (batch // d) >= 2]
    pool = even or multi or fitting
    return max(pool)


# ----------------------------------------------------------------------------- wrapper
def attention_forward(s, enc_output, weight, *, tile_budget_bytes=None):
    """s: [B, 1, H], enc_output: [B, L, H], weight: [1, 2H] -> softmax [B, 1, L].

    enc_output may be f32 or bf16 (bf16 halves the dominant HBM stream; the
    kernel accumulates in f32 either way).
    """
    B, one, H = s.shape
    assert one == 1
    Bn, L, He = enc_output.shape
    assert Bn == B and He == H
    assert weight.shape == (1, 2 * H)

    # NOTE: dropping the s-half of the weight (and implicitly any bias) is only
    # valid because the module is a *pure* Linear with bias=False and no
    # nonlinearity: s.w_s is constant along src_len and cancels under softmax.
    w_e = weight[:, H:]

    itemsize = enc_output.dtype.itemsize
    row_bytes = L * H * itemsize

    vmem_cap = _vmem_capacity_bytes()
    if tile_budget_bytes is None:
        # ~16 MiB tiles on 128 MiB chips (v5e/v6e), ~12.8 MiB on v7x (64 MiB VMEM).
        tile_budget_bytes = min(16 << 20, vmem_cap // 5)

    cost = pl.CostEstimate(
        flops=2 * B * L * H + 6 * B * L,
        transcendentals=B * L,
        bytes_accessed=B * L * H * itemsize + B * L * 4
        + weight.size * weight.dtype.itemsize,
    )

    bt = _pick_batch_tile(B, row_bytes, tile_budget_bytes)

    if bt is not None:
        # ---- fused path: one kernel does matvec + softmax, batch-blocked grid.
        tile_bytes = bt * row_bytes + bt * L * 4
        probs = pl.pallas_call(
            _attention_fused_kernel,
            out_shape=jax.ShapeDtypeStruct((B, L), jnp.float32),
            grid_spec=pltpu.PrefetchScalarGridSpec(
                num_scalar_prefetch=0,
                grid=(B // bt,),
                in_specs=[
                    pl.BlockSpec((bt, L, H), lambda i: (i, 0, 0)),
                    pl.BlockSpec((1, H), lambda i: (0, 0)),
                ],
                out_specs=pl.BlockSpec((bt, L), lambda i: (i, 0)),
            ),
            compiler_params=pltpu.CompilerParams(
                dimension_semantics=("parallel",),
                vmem_limit_bytes=_vmem_limit_bytes(tile_bytes, vmem_cap),
            ),
            cost_estimate=cost,
        )(enc_output, w_e)
        return probs.reshape(B, 1, L)

    # ---- fallback: a single (1, L, H) slab exceeds the tile budget -> tile L.
    # Pallas computes raw scores (lane-dense 128-multiple L tiles); XLA does the
    # softmax over L (negligible extra traffic vs. the [B, L, H] read).
    lt = max(128, (tile_budget_bytes // max(H * itemsize, 1)) // 128 * 128)
    lt = min(lt, L)
    tile_bytes = lt * H * itemsize + lt * 4
    scores = pl.pallas_call(
        _scores_kernel,
        out_shape=jax.ShapeDtypeStruct((B, 1, L), jnp.float32),
        grid_spec=pltpu.PrefetchScalarGridSpec(
            num_scalar_prefetch=0,
            grid=(B, pl.cdiv(L, lt)),
            in_specs=[
                pl.BlockSpec((1, lt, H), lambda b, j: (b, j, 0)),
                pl.BlockSpec((1, H), lambda b, j: (0, 0)),
            ],
            out_specs=pl.BlockSpec((1, 1, lt), lambda b, j: (b, 0, j)),
        ),
        compiler_params=pltpu.CompilerParams(
            dimension_semantics=("parallel", "parallel"),
            vmem_limit_bytes=_vmem_limit_bytes(tile_bytes, vmem_cap),
        ),
        cost_estimate=cost,
    )(enc_output, w_e)
    # TODO(synk): H-axis tiling for the extreme case where even a (1, 128, H)
    # slab exceeds VMEM (very large hidden dims).
    return jax.nn.softmax(scores, axis=-1)


# ----------------------------------------------------------------------------- reference
def reference_forward(s, enc_output, weight):
    """Plain-JAX reproduction of the PyTorch forward (for verification)."""
    B, _, H = s.shape
    L = enc_output.shape[1]
    s_rep = jnp.broadcast_to(s, (B, L, H))                 # s.repeat(1, src_len, 1)
    cat = jnp.concatenate((s_rep, enc_output), axis=2)     # [B, L, 2H]
    scores = jnp.einsum("blk,ok->blo", cat, weight)        # Linear(2H -> 1)
    scores = jnp.transpose(scores, (0, 2, 1))              # [B, 1, L]
    return jax.nn.softmax(scores, axis=2)


if __name__ == "__main__":
    enc_hid_dim = 32
    dec_hid_dim = 32
    batch = 2
    src_len = 8

    key = jax.random.PRNGKey(0)
    k_s, k_enc, k_w, k_enc2 = jax.random.split(key, 4)

    # Deterministic inputs / parameters (PyTorch module shapes).
    s = jax.random.normal(k_s, (batch, 1, dec_hid_dim), dtype=jnp.float32)
    enc_output = jax.random.normal(
        k_enc, (batch, src_len, enc_hid_dim), dtype=jnp.float32)

    # nn.Linear(2*dec_hid_dim, 1, bias=False): weight (1, 2*dec_hid_dim),
    # init U(-1/sqrt(fan_in), 1/sqrt(fan_in)).
    fan_in = 2 * dec_hid_dim
    bound = 1.0 / (fan_in ** 0.5)
    weight = jax.random.uniform(
        k_w, (1, fan_in), minval=-bound, maxval=bound, dtype=jnp.float32)

    # 1) Fused path, f32 (the PyTorch-equivalent case).
    out = jax.block_until_ready(attention_forward(s, enc_output, weight))
    ref = reference_forward(s, enc_output, weight)
    assert out.shape == (batch, 1, src_len)
    assert jnp.allclose(out, ref, atol=1e-5, rtol=1e-5), "f32 fused path mismatch"

    # 2) Fused path, bf16 encoder input (bandwidth-halving option).
    enc_bf16 = enc_output.astype(jnp.bfloat16)
    out_bf = jax.block_until_ready(attention_forward(s, enc_bf16, weight))
    ref_bf = reference_forward(s, enc_bf16.astype(jnp.float32), weight)
    assert jnp.allclose(out_bf, ref_bf, atol=1e-5, rtol=1e-5), "bf16 path mismatch"

    # 3) L-tiled fallback path (forced with a tiny tile budget).
    L2, H2 = 256, 128
    s2 = jax.random.normal(k_s, (batch, 1, H2), dtype=jnp.float32)
    enc2 = jax.random.normal(k_enc2, (batch, L2, H2), dtype=jnp.float32)
    w2 = jax.random.uniform(
        k_w, (1, 2 * H2), minval=-0.1, maxval=0.1, dtype=jnp.float32)
    out2 = jax.block_until_ready(
        attention_forward(s2, enc2, w2, tile_budget_bytes=64 * 1024))
    ref2 = reference_forward(s2, enc2, w2)
    assert out2.shape == (batch, 1, L2)
    assert jnp.allclose(out2, ref2, atol=1e-5, rtol=1e-5), "L-tiled path mismatch"

    print("KERNEL_OK")
</pallas_src>

<mosaic_0001>
module attributes {stable_mosaic.version = 11 : i64} {
  func.func @_attention_fused_kernel(%arg0: i32, %arg1: memref<2x8x32xf32, #tpu.memory_space<vmem>>, %arg2: memref<1x32xf32, #tpu.memory_space<vmem>>, %arg3: memref<2x8xf32, #tpu.memory_space<vmem>>) attributes {dimension_semantics = [#tpu.dimension_semantics<parallel>], iteration_bounds = array<i64: 1>, scalar_prefetch = 0 : i64, scratch_operands = 0 : i64, tpu.core_type = #tpu.core_type<tc>, window_params = [{transform_indices = @transform_0, window_bounds = array<i64: 2, 8, 32>}, {pipeline_mode = #tpu.pipeline_mode<synchronous>, transform_indices = @transform_1, window_bounds = array<i64: 1, 32>}, {transform_indices = @transform_2, window_bounds = array<i64: 2, 8>}]} {
    %c0 = arith.constant 0 : index
    %c0_0 = arith.constant 0 : index
    %c0_1 = arith.constant 0 : index
    %0 = vector.load %arg1[%c0, %c0_0, %c0_1] : memref<2x8x32xf32, #tpu.memory_space<vmem>>, vector<2x8x32xf32>
    %c0_2 = arith.constant 0 : index
    %c0_3 = arith.constant 0 : index
    %1 = vector.load %arg2[%c0_2, %c0_3] : memref<1x32xf32, #tpu.memory_space<vmem>>, vector<1x32xf32>
    %2 = vector.shape_cast %1 : vector<1x32xf32> to vector<1x1x32xf32>
    %3 = vector.broadcast %2 : vector<1x1x32xf32> to vector<2x8x32xf32>
    %4 = arith.mulf %0, %3 : vector<2x8x32xf32>
    %cst = arith.constant dense<0.000000e+00> : vector<2x8xf32>
    %5 = vector.multi_reduction <add>, %4, %cst [2] : vector<2x8x32xf32> to vector<2x8xf32>
    %cst_4 = arith.constant dense<0xFF800000> : vector<2xf32>
    %6 = vector.multi_reduction <maximumf>, %5, %cst_4 [1] : vector<2x8xf32> to vector<2xf32>
    %7 = vector.shape_cast %6 : vector<2xf32> to vector<2x1xf32>
    %8 = vector.broadcast %7 : vector<2x1xf32> to vector<2x8xf32>
    %9 = arith.subf %5, %8 : vector<2x8xf32>
    %10 = math.exp %9 : vector<2x8xf32>
    %cst_5 = arith.constant dense<0.000000e+00> : vector<2xf32>
    %11 = vector.multi_reduction <add>, %10, %cst_5 [1] : vector<2x8xf32> to vector<2xf32>
    %12 = vector.shape_cast %11 : vector<2xf32> to vector<2x1xf32>
    %13 = tpu.reciprocal %12 {approx = true} : vector<2x1xf32> -> vector<2x1xf32>
    %14 = arith.mulf %12, %13 : vector<2x1xf32>
    %cst_6 = arith.constant 2.000000e+00 : f32
    %15 = vector.broadcast %cst_6 : f32 to vector<2x1xf32>
    %16 = arith.subf %15, %14 : vector<2x1xf32>
    %17 = arith.mulf %13, %16 : vector<2x1xf32>
    %18 = vector.broadcast %17 : vector<2x1xf32> to vector<2x8xf32>
    %19 = arith.mulf %10, %18 : vector<2x8xf32>
    %c0_7 = arith.constant 0 : index
    %c0_8 = arith.constant 0 : index
    %20 = vector.load %arg3[%c0_7, %c0_8] : memref<2x8xf32, #tpu.memory_space<vmem>>, vector<2x8xf32>
    tpu.vector_store %arg3[%c0_7, %c0_8], %19 {strides = array<i32>} : memref<2x8xf32, #tpu.memory_space<vmem>>, vector<2x8xf32>,
    return
  }
  func.func @transform_0(%arg0: i32) -> (i32, i32, i32) {
    %c0_i32 = arith.constant 0 : i32
    %c0_i32_0 = arith.constant 0 : i32
    %c0_i32_1 = arith.constant 0 : i32
    return %arg0, %c0_i32, %c0_i32_0 : i32, i32, i32
  }
  func.func @transform_1(%arg0: i32) -> (i32, i32) {
    %c0_i32 = arith.constant 0 : i32
    %c0_i32_0 = arith.constant 0 : i32
    %c0_i32_1 = arith.constant 0 : i32
    return %c0_i32, %c0_i32_0 : i32, i32
  }
  func.func @transform_2(%arg0: i32) -> (i32, i32) {
    %c0_i32 = arith.constant 0 : i32
    %c0_i32_0 = arith.constant 0 : i32
    return %arg0, %c0_i32 : i32, i32
  }
}

</mosaic_0001>

<bundles_post_ra>
// kernel: tpu_custom_call.1
= control target key start
LH: loop header
LB: loop body
LE: loop exit
PB: predicated region body
PF: predicated region fallthrough
CT: control target
= control target key end

     0   :  { %7 = vsyncpa [#allocation3], 0  ;;  %s245_s0 = inlined_call_operand.hbm [shape: f32[2,8,32], index: 0, kind: input, shape index: {}]   ;;  %s246_s1 = inlined_call_operand.vmem [shape: f32[1,32], index: 1, kind: input, shape index: {}]   ;;  %s247_s2 = inlined_call_operand.hbm [shape: f32[2,8], index: 2, kind: output, shape index: {}]  }
   0x1   :  { %8 = vsyncpa [#allocation4], 0  ;;  %s210_s9 = smov [#allocation2]  }
   0x2   :  { %s14_s10 = sshll.u32 %s210_s9, 4  ;;  %s15_s10 = int_to_ptr.vmem [resolvable:$true] %s14_s10 }
   0x3   :  { %s174_s11 = scalar_lea.vmem %s15_s10, 256  ;;  %p179_p1 = scmp.lt.s32.totalorder %s15_s10, %s15_s10 }
   0x4   :  { %p175_p0 = scmp.ne.s32.totalorder %s15_s10, %s174_s11  ;;  %p180_p2 = scmp.lt.s32.totalorder %s174_s11, %s174_s11 }
   0x6   :  { %p181_p3 = por %p180_p2, %p179_p1 }
   0x8   :  { %p182_p4 = pnand %p181_p3, %p175_p0 }
   0xa   :  { %185 = shalt.err (!%p182_p4)
}
   0xb   :  { %s211_s12 = smov 128   ;;  %s212_s13 = smov 8  }
   0xc   :  { %20 = dma.hbm_to_vmem [thread:$0]  %s245_s0, 256, %s15_s10, [#allocation3], %s211_s12, %s211_s12, %s212_s13  }
   0xd   :  { %206 = dma.done.wait [#allocation3], 256  }
   0xe   :  { %207 = vsyncadd [#allocation3], 4294967040  ;;  %v26_v0 = vld [vmem:[#allocation2] sm:$0xff]  ;;  %vm37_vm0 = vcmask 261120   ;;  %v27_v2 = vld [vmem:[#allocation2 + $0x8] sm:$0xff]  ;;  %v46_v7 = vlaneseq  ;;  %vm56_vm1 = vcmask 1041409  }
   0xf   :  { %v152_v1 = vld [vmem:[%s246_s1] ss:$0 sm:$0xff]  ;;  %vm59_vm2 = vcmask 58368   ;;  %v213_v17 = vmov 0   ;;  %s214_s0 = smov [#allocation5]  }
  0x10   :  { %v35_v3 = vmul.f32 %v152_v1, %v26_v0  ;;  %v36_v4 = vmul.f32 %v152_v1, %v27_v2  ;;  %v47_v8 = vand.u32 127, %v46_v7  ;;  %v49_v9 = vshrl.u32 %v46_v7, 7  ;;  %159 = vset.pattern.permute.xlu0 %v213_v17  ;;  %158 = vset.pattern.permute.xlu1 %v213_v17  ;;  %s143_s1 = sshll.u32 %s214_s0, 4  ;;  %s144_s1 = int_to_ptr.vmem [resolvable:$true] %s143_s1 }
  0x11   :  { %s186_s18 = scalar_lea.vmem %s144_s1, 32  ;;  %p191_p6 = scmp.lt.s32.totalorder %s144_s1, %s144_s1 }
  0x12   :  { %v38_v5 = vsel %vm37_vm0, %v35_v3, 0.0  ;;  %v41_v6 = vsel %vm37_vm0, %v36_v4, 0.0  ;;  %v50_v11 = vsub.s32 %v47_v8, %v49_v9  ;;  %v66_v18 = vsub.s32 0, %v49_v9  ;;  %p187_p5 = scmp.ne.s32.totalorder %s144_s1, %s186_s18  ;;  %p192_p7 = scmp.lt.s32.totalorder %s186_s18, %s186_s18 }
  0x13   :  { %39 = vadd.xlane.f32.xlu0 %v38_v5  ;;  %v70_v19 = vsub.s32 1, %v49_v9 }
  0x14   :  { %p193_p8 = por %p192_p7, %p191_p6 }
  0x16   :  { %p194_p9 = pnand %p193_p8, %p187_p5 }
  0x17   :  { %42 = vadd.xlane.f32.xlu0 %v41_v6 }
  0x9c   :  { %v40_v10 = vpop.xlane.xlu0 %39 }
  0x9d   :  { %v51_v13 = vrot.slane %v40_v10, %v50_v11 }
  0xa0   :  { %v43_v12 = vpop.xlane.xlu0 %42 }
  0xa1   :  { %v55_v14 = vrot.slane %v43_v12, %v50_v11 }
  0xa3   :  { %v57_v15 = vsel %vm56_vm1, %v55_v14, %v51_v13 }
  0xa4   :  { %v60_v16 = vsel %vm59_vm2, %v57_v15, -inf }
  0xa5   :  { %61 = vmax.xlane.f32.xlu1 %v60_v16 }
 0x12e   :  { %v62_v20 = vpop.xlane.xlu1 %61 }
 0x12f   :  { %v67_v21 = vrot.slane %v62_v20, %v66_v18  ;;  %v71_v22 = vrot.slane %v62_v20, %v70_v19 }
 0x131   :  { %v74_v23 = vsub.f32 %v40_v10, %v67_v21  ;;  %v75_v24 = vsub.f32 %v43_v12, %v71_v22 }
 0x133   :  { %v76_v25 = vmul.f32 1.442695, %v74_v23  ;;  %v78_v26 = vmul.f32 1.442695, %v75_v24 }
 0x135   :  { %160 = vpow2.f32 %v76_v25 }
 0x136   :  { %162 = vpow2.f32 %v78_v26 }
 0x142   :  { %v161_v27 = vpop.eup %160 }
 0x143   :  { %v163_v28 = vpop.eup %162  ;;  %83 = vperm.xlu1 %158, %v161_v27  }
 0x144   :  { %86 = vperm.xlu0 %159, %v163_v28  }
 0x1be   :  { %v84_v29 = vpop.permute.xlu1 %83 }
 0x1bf   :  { %v87_v30 = vpop.permute.xlu0 %86  ;;  %v91_v31 = vrot.slane %v84_v29, %v50_v11 }
 0x1c0   :  { %v95_v32 = vrot.slane %v87_v30, %v50_v11 }
 0x1c2   :  { %v96_v33 = vsel %vm56_vm1, %v95_v32, %v91_v31 }
 0x1c3   :  { %v98_v34 = vsel %vm59_vm2, %v96_v33, 0.0 }
 0x1c4   :  { %99 = vadd.xlane.f32.xlu1 %v98_v34 }
 0x24d   :  { %v100_v35 = vpop.xlane.xlu1 %99 }
 0x24e   :  { %164 = vrcp.f32 %v100_v35 }
 0x25b   :  { %v165_v36 = vpop.eup %164 }
 0x25c   :  { %v102_v37 = vmul.f32 %v165_v36, %v100_v35 }
 0x25e   :  { %v103_v38 = vsub.f32 2.0, %v102_v37 }
 0x260   :  { %v104_v39 = vmul.f32 %v165_v36, %v103_v38 }
 0x262   :  { %v109_v40 = vrot.slane %v104_v39, %v66_v18  ;;  %v113_v41 = vrot.slane %v104_v39, %v70_v19 }
 0x264   :  { %v116_v42 = vmul.f32 %v161_v27, %v109_v40  ;;  %v117_v43 = vmul.f32 %v163_v28, %v113_v41 }
 0x266   :  { %121 = vperm.xlu0 %159, %v116_v42  }
 0x26a   :  { %124 = vperm.xlu0 %159, %v117_v43  }
 0x2e1   :  { %v122_v44 = vpop.permute.xlu0 %121 }
 0x2e2   :  { %v129_v46 = vrot.slane %v122_v44, %v50_v11 }
 0x2e5   :  { %v125_v45 = vpop.permute.xlu0 %124 }
 0x2e6   :  { %v133_v47 = vrot.slane %v125_v45, %v50_v11 }
 0x2e8   :  { %v134_v48 = vsel %vm56_vm1, %v133_v47, %v129_v46 }
 0x2e9   :  { %136 = vst.msk [vmem:[#allocation5] sm:$0x3] %vm59_vm2, %v134_v48 }
 0x2ea   :  { %197 = shalt.err (!%p194_p9)
}
 0x2eb   :  { %146 = dma.vmem_to_hbm [thread:$0]  %s144_s1, 32, %s247_s2, [#allocation4]  }
 0x2ec   :  { %208 = dma.done.wait [#allocation4], 32  }
 0x2ed   :  { %209 = vsyncadd [#allocation4], 4294967264 }
 0x2ee   :  { %150 = vsyncpa [#allocation3], 1 }
 0x2ef   :  { %151 = vsyncpa [#allocation4], 1 }

</bundles_post_ra>
